<compile_context>
chip_gen: v5e
topology: v5e:2x2
jax: 0.10.0
libtpu: 0.0.40
codegen_flags: <defaults>
</compile_context>

<pallas_src>
import jax
import jax.numpy as jnp
from jax.experimental import pallas as pl
from jax.experimental.pallas import tpu as pltpu


# ---- fused weight-slab layout (16 rows x 42 cols, f32) ----------------------
#   cols  0: 7 -> W1 (16, 7)      col  7 -> b1 (16,)
#   cols  8:24 -> W2 (16, 16)     col 24 -> b2 (16,)
#   cols 25:41 -> W3 ( 4, 16)     col 41 -> b3 ( 4,)     (rows 4:16 unused)
SLAB_SHAPE = (16, 42)


def sentiment_net_kernel(x_ref, w_ref, out_ref):
    x = x_ref[...]                                    # (7, Bt) f32, lane-dense

    w1 = w_ref[:, 0:7]                                # (16, 7)
    b1 = w_ref[:, 7:8]                                # (16, 1)
    w2 = w_ref[:, 8:24]                               # (16, 16)
    b2 = w_ref[:, 24:25]                              # (16, 1)
    w3 = w_ref[0:4, 25:41]                            # (4, 16)
    b3 = w_ref[0:4, 41:42]                            # (4, 1)

    # fc1 + ReLU   (MXU: M=16, K=7, N=B_tile)
    h1 = jnp.dot(w1, x, preferred_element_type=jnp.float32) + b1
    h1 = jnp.maximum(h1, 0.0)                         # (16, Bt)

    # fc2 + ReLU
    h2 = jnp.dot(w2, h1, preferred_element_type=jnp.float32) + b2
    h2 = jnp.maximum(h2, 0.0)                         # (16, Bt)

    # fc3
    logits = jnp.dot(w3, h2, preferred_element_type=jnp.float32) + b3  # (4, Bt)

    # log_softmax over the class axis (axis 0: 4-sublane reduce -> XLU,
    # exp -> EUP; both off the critical VPU/store path). Numerically stable.
    m = jnp.max(logits, axis=0, keepdims=True)        # (1, Bt)
    shifted = logits - m
    lse = jnp.log(jnp.sum(jnp.exp(shifted), axis=0, keepdims=True))
    out_ref[...] = shifted - lse                      # (4, Bt), lane-dense store


def sentiment_net_forward(x, slab, *, b_tile=512):
    """x: (B, 7) float32. slab: (16, 42) fused params. Returns (B, 4) log-probs."""
    B = x.shape[0]
    n_tiles = pl.cdiv(B, b_tile)
    b_pad = n_tiles * b_tile

    # Feature-major, lane-padded input (pure layout plumbing in XLA).
    xt = jnp.zeros((7, b_pad), jnp.float32).at[:, :B].set(x.astype(jnp.float32).T)

    out_t = pl.pallas_call(
        sentiment_net_kernel,
        out_shape=jax.ShapeDtypeStruct((4, b_pad), jnp.float32),
        grid_spec=pl.GridSpec(
            grid=(n_tiles,),
            in_specs=[
                pl.BlockSpec((7, b_tile), lambda i: (0, i)),   # streamed batch tile
                pl.BlockSpec(SLAB_SHAPE, lambda i: (0, 0)),    # resident weights
            ],
            out_specs=pl.BlockSpec((4, b_tile), lambda i: (0, i)),
        ),
        compiler_params=pltpu.CompilerParams(
            dimension_semantics=("parallel",)),  # megacore on v7x; no-op on v5e/v6e
    )(xt, slab)

    return out_t[:, :B].T                             # back to (B, 4)


def init_params(key):
    """PyTorch nn.Linear-style init: W is (out, in), b is (out,), U[-1/sqrt(fan_in), +]."""
    ks = jax.random.split(key, 6)

    def linear(kw, kb, fan_in, fan_out):
        bound = fan_in ** -0.5
        w = jax.random.uniform(kw, (fan_out, fan_in), jnp.float32, -bound, bound)
        b = jax.random.uniform(kb, (fan_out,), jnp.float32, -bound, bound)
        return w, b

    w1, b1 = linear(ks[0], ks[1], 7, 16)
    w2, b2 = linear(ks[2], ks[3], 16, 16)
    w3, b3 = linear(ks[4], ks[5], 16, 4)
    return {"w1": w1, "b1": b1, "w2": w2, "b2": b2, "w3": w3, "b3": b3}


def pack_params(p):
    """Fuse the six weight/bias arrays into one (16, 42) f32 slab."""
    slab = jnp.zeros(SLAB_SHAPE, jnp.float32)
    slab = slab.at[:, 0:7].set(p["w1"])
    slab = slab.at[:, 7].set(p["b1"])
    slab = slab.at[:, 8:24].set(p["w2"])
    slab = slab.at[:, 24].set(p["b2"])
    slab = slab.at[0:4, 25:41].set(p["w3"])
    slab = slab.at[0:4, 41].set(p["b3"])
    return slab


def reference_forward(x, p):
    """Pure-JAX reference matching the PyTorch module exactly."""
    h1 = jnp.maximum(x @ p["w1"].T + p["b1"], 0.0)
    h2 = jnp.maximum(h1 @ p["w2"].T + p["b2"], 0.0)
    logits = h2 @ p["w3"].T + p["b3"]
    return jax.nn.log_softmax(logits, axis=1)


if __name__ == "__main__":
    key = jax.random.PRNGKey(0)
    k_param, k_x = jax.random.split(key)

    params = init_params(k_param)
    slab = pack_params(params)

    B = 1000  # deliberately not a tile multiple: exercises padding + 2 grid tiles
    x = jax.random.normal(k_x, (B, 7), dtype=jnp.float32)

    out = sentiment_net_forward(x, slab, b_tile=512)
    out = jax.block_until_ready(out)

    ref = reference_forward(x, params)
    assert out.shape == (B, 4)
    assert jnp.allclose(out, ref, atol=1e-4, rtol=1e-4), "mismatch vs reference"
    # log-probs sanity: rows exponentiate-sum to 1
    assert jnp.allclose(jnp.exp(out).sum(axis=1), 1.0, atol=1e-4)

    print("KERNEL_OK")
</pallas_src>

<mosaic_0001>
module attributes {stable_mosaic.version = 11 : i64} {
  func.func @sentiment_net_kernel(%arg0: i32, %arg1: memref<7x512xf32, #tpu.memory_space<vmem>>, %arg2: memref<16x42xf32, #tpu.memory_space<vmem>>, %arg3: memref<4x512xf32, #tpu.memory_space<vmem>>) attributes {dimension_semantics = [#tpu.dimension_semantics<parallel>], iteration_bounds = array<i64: 2>, scalar_prefetch = 0 : i64, scratch_operands = 0 : i64, tpu.core_type = #tpu.core_type<tc>, window_params = [{transform_indices = @transform_0, window_bounds = array<i64: 7, 512>}, {pipeline_mode = #tpu.pipeline_mode<synchronous>, transform_indices = @transform_1, window_bounds = array<i64: 16, 42>}, {transform_indices = @transform_2, window_bounds = array<i64: 4, 512>}]} {
    %c0 = arith.constant 0 : index
    %c0_0 = arith.constant 0 : index
    %0 = vector.load %arg1[%c0, %c0_0] : memref<7x512xf32, #tpu.memory_space<vmem>>, vector<7x512xf32>
    %c0_1 = arith.constant 0 : index
    %c0_2 = arith.constant 0 : index
    %1 = vector.load %arg2[%c0_1, %c0_2] : memref<16x42xf32, #tpu.memory_space<vmem>>, vector<16x7xf32>
    %c0_3 = arith.constant 0 : index
    %c7 = arith.constant 7 : index
    %2 = vector.load %arg2[%c0_3, %c7] : memref<16x42xf32, #tpu.memory_space<vmem>>, vector<16x1xf32>
    %c0_4 = arith.constant 0 : index
    %c8 = arith.constant 8 : index
    %3 = vector.load %arg2[%c0_4, %c8] : memref<16x42xf32, #tpu.memory_space<vmem>>, vector<16x16xf32>
    %c0_5 = arith.constant 0 : index
    %c24 = arith.constant 24 : index
    %4 = vector.load %arg2[%c0_5, %c24] : memref<16x42xf32, #tpu.memory_space<vmem>>, vector<16x1xf32>
    %c0_6 = arith.constant 0 : index
    %c25 = arith.constant 25 : index
    %5 = vector.load %arg2[%c0_6, %c25] : memref<16x42xf32, #tpu.memory_space<vmem>>, vector<4x16xf32>
    %c0_7 = arith.constant 0 : index
    %c41 = arith.constant 41 : index
    %6 = vector.load %arg2[%c0_7, %c41] : memref<16x42xf32, #tpu.memory_space<vmem>>, vector<4x1xf32>
    %cst = arith.constant dense<0.000000e+00> : vector<16x512xf32>
    %7 = tpu.matmul %1, %0, %cst {dimension_numbers = #tpu.dot_dimension_numbers<[1], [0], [0], [1], [0, 0, 1, 1], [], []>} : vector<16x7xf32>, vector<7x512xf32>, vector<16x512xf32> -> vector<16x512xf32>
    %8 = vector.broadcast %2 : vector<16x1xf32> to vector<16x512xf32>
    %9 = arith.addf %7, %8 : vector<16x512xf32>
    %cst_8 = arith.constant 0.000000e+00 : f32
    %10 = vector.broadcast %cst_8 : f32 to vector<16x512xf32>
    %11 = arith.maximumf %9, %10 : vector<16x512xf32>
    %cst_9 = arith.constant dense<0.000000e+00> : vector<16x512xf32>
    %12 = tpu.matmul %3, %11, %cst_9 {dimension_numbers = #tpu.dot_dimension_numbers<[1], [0], [0], [1], [0, 0, 1, 1], [], []>} : vector<16x16xf32>, vector<16x512xf32>, vector<16x512xf32> -> vector<16x512xf32>
    %13 = vector.broadcast %4 : vector<16x1xf32> to vector<16x512xf32>
    %14 = arith.addf %12, %13 : vector<16x512xf32>
    %cst_10 = arith.constant 0.000000e+00 : f32
    %15 = vector.broadcast %cst_10 : f32 to vector<16x512xf32>
    %16 = arith.maximumf %14, %15 : vector<16x512xf32>
    %cst_11 = arith.constant dense<0.000000e+00> : vector<4x512xf32>
    %17 = tpu.matmul %5, %16, %cst_11 {dimension_numbers = #tpu.dot_dimension_numbers<[1], [0], [0], [1], [0, 0, 1, 1], [], []>} : vector<4x16xf32>, vector<16x512xf32>, vector<4x512xf32> -> vector<4x512xf32>
    %18 = vector.broadcast %6 : vector<4x1xf32> to vector<4x512xf32>
    %19 = arith.addf %17, %18 : vector<4x512xf32>
    %cst_12 = arith.constant dense<0xFF800000> : vector<512xf32>
    %20 = vector.multi_reduction <maximumf>, %19, %cst_12 [0] : vector<4x512xf32> to vector<512xf32>
    %21 = vector.shape_cast %20 : vector<512xf32> to vector<1x512xf32>
    %22 = vector.broadcast %21 : vector<1x512xf32> to vector<4x512xf32>
    %23 = arith.subf %19, %22 : vector<4x512xf32>
    %24 = math.exp %23 : vector<4x512xf32>
    %cst_13 = arith.constant dense<0.000000e+00> : vector<512xf32>
    %25 = vector.multi_reduction <add>, %24, %cst_13 [0] : vector<4x512xf32> to vector<512xf32>
    %26 = vector.shape_cast %25 : vector<512xf32> to vector<1x512xf32>
    %27 = math.log %26 : vector<1x512xf32>
    %28 = vector.broadcast %27 : vector<1x512xf32> to vector<4x512xf32>
    %29 = arith.subf %23, %28 : vector<4x512xf32>
    %c0_14 = arith.constant 0 : index
    %c0_15 = arith.constant 0 : index
    %30 = vector.load %arg3[%c0_14, %c0_15] : memref<4x512xf32, #tpu.memory_space<vmem>>, vector<4x512xf32>
    tpu.vector_store %arg3[%c0_14, %c0_15], %29 {strides = array<i32>} : memref<4x512xf32, #tpu.memory_space<vmem>>, vector<4x512xf32>,
    return
  }
  func.func @transform_0(%arg0: i32) -> (i32, i32) {
    %c0_i32 = arith.constant 0 : i32
    %c0_i32_0 = arith.constant 0 : i32
    return %c0_i32, %arg0 : i32, i32
  }
  func.func @transform_1(%arg0: i32) -> (i32, i32) {
    %c0_i32 = arith.constant 0 : i32
    %c0_i32_0 = arith.constant 0 : i32
    %c0_i32_1 = arith.constant 0 : i32
    return %c0_i32, %c0_i32_0 : i32, i32
  }
  func.func @transform_2(%arg0: i32) -> (i32, i32) {
    %c0_i32 = arith.constant 0 : i32
    %c0_i32_0 = arith.constant 0 : i32
    return %c0_i32, %arg0 : i32, i32
  }
}

</mosaic_0001>

<bundles_post_ra>
// kernel: tpu_custom_call.1
= control target key start
LH: loop header
LB: loop body
LE: loop exit
PB: predicated region body
PF: predicated region fallthrough
CT: control target
= control target key end

     0   :  { %7 = vsyncpa [#allocation3], 0  ;;  %s1164_s0 = inlined_call_operand.hbm [shape: f32[7,1024], index: 0, kind: input, shape index: {}]   ;;  %s1165_s1 = inlined_call_operand.hbm [shape: f32[16,42], index: 1, kind: input, shape index: {}]   ;;  %s1166_s2 = inlined_call_operand.hbm [shape: f32[4,1024], index: 2, kind: output, shape index: {}]  }
   0x1   :  { %9 = vsyncpa [#allocation3 + $0x1], 0 }
   0x2   :  { %10 = vsyncpa [#allocation6], 0 }
   0x3   :  { %11 = vsyncpa [#allocation4], 0 }
   0x4   :  { %13 = vsyncpa [#allocation4 + $0x1], 0  ;;  %s993_s9 = smov 0   ;;  %s995_s10 = smov 0  }
   0x5   :  { %s997_s11 = smov 0   ;;  %s999_s12 = smov 0  }
   0x6 LB: > { %s108_s15 = sshll.u32 %s1165_s1, 4  ;;  %s1017_s16 = sadd.s32 4294967295, %s968_s12   ;;  %s968_s12 = sphi %s999_s12, %s1176_s12   ;;  %s964_s11 = sphi %s997_s11, %s1175_s11   ;;  %s960_s10 = sphi %s995_s10, %s1174_s10   ;;  %s956_s9 = sphi %s993_s9, %s1173_s9   ;;  %s109_s15 = int_to_ptr.hbm [resolvable:$true] %s108_s15 }
   0x7   : > { %p713_p0 = scmp.ge.s32.totalorder %s968_s12, 1  ;;  %p40_p1 = scmp.eq.s32.totalorder %s1017_s16, 0 }
   0x8   : > { %p97_p2 = scmp.lt.s32.totalorder %s968_s12, 3  ;;  %s970_s18 = smov [#allocation5]  }
   0x9   : > { %s110_s19 = sshll.u32 %s970_s18, 4  ;;  %s971_s20 = smov 128   ;;  %s111_s19 = int_to_ptr.vmem [resolvable:$true] %s110_s19 }
   0xa   : > { %p1022_p3 = pnand %p713_p0, %p97_p2  ;;  %s972_s21 = smov 8  }
   0xb   : > { %s712_s22 = sadd.s32 4294967294, %s968_s12   ;;  %s1033_s23 = sadd.s32 1, %s968_s12  }
   0xc   : > { %p762_p4 = pneg %p1022_p3  ;;  %s26_s24 = sadd.s32 1, %s964_s11 }
   0xd   : > { %s23_s25 = ssub.s32 %s968_s12, %s1033_s23  ;;  %p33_p7 = scmp.ne.s32.totalorder %s964_s11, %s960_s10 }
   0xe   : > { %p763_p6 = pnand %p762_p4, %p40_p1  ;;  %p24_p8 = scmp.eq.s32.totalorder %s23_s25, 0 }
   0xf   : > { %p34_p9 = scmp.eq.s32.totalorder %s968_s12, 0  ;;  %p39_p10 = scmp.ne.s32.totalorder %s960_s10, %s956_s9 }
  0x10   : > { %765 = dma.hbm_to_vmem [thread:$0]  (!%p763_p6), %s109_s15, 256, %s111_s19, [#allocation6], %s971_s20, %s971_s20, %s972_s21  }
  0x11   : > { %p84_p11 = scmp.eq.s32.totalorder %s1017_s16, 1  ;;  %p1049_p12 = por %p40_p1, %p39_p10 }
  0x12   : > { %s1045_s26 = scalar_select %p24_p8, %s964_s11, %s26_s24  }
  0x13   : > { %p1053_p13 = por %p84_p11, %p33_p7  ;;  %p90_p0 = scmp.eq.s32.totalorder %s712_s22, 1 }
  0x14   : > { %p35_p2 = por %p34_p9, %p33_p7  ;;  %s124_s29 = sand.u32 1, %s964_s11  }
  0x15   : > { %p1058_p4 = por %p90_p0, %p39_p10  ;;  %p775_p6 = scmp.lt.s32.totalorder %s968_s12, 2 }
  0x16   : > { %s716_s3 = sshll.u32 %s124_s29, 5  ;;  %s752_s4 = sshll.u32 %s968_s12, 5 }
  0x17   : > { %s133_s7 = scalar_lea.hbm %s1164_s0, %s752_s4  ;;  %s128_s13 = scalar_lea.vmem [#allocation2], %s716_s3 }
  0x18   : > { %s135_s8 = sshll.u32 %s133_s7, 4  ;;  %s137_s14 = sshll.u32 %s128_s13, 4  ;;  %s136_s8 = int_to_ptr.hbm [resolvable:$true] %s135_s8  ;;  %s138_s14 = int_to_ptr.vmem [resolvable:$true] %s137_s14 }
  0x19   : > { %p1067_p8 = pnand %p775_p6, %p35_p2  ;;  %s125_s18 = scalar_lea.sflag [#allocation3], %s124_s29 }
  0x1a   : > { %s868_s19 = sshra.s32 %s136_s8, 4  ;;  %s875_s24 = scalar_lea.hbm %s1164_s0, 64  ;;  %s869_s19 = int_to_ptr.hbm [resolvable:$true] %s868_s19 }
  0x1b   : > { %s870_s20 = scalar_lea.hbm %s869_s19, 32  ;;  %p872_p9 = pneg %p1067_p8 }
  0x1c   : > { %p871_p7 = scmp.ne.s32.totalorder %s869_s19, %s870_s20  ;;  %p876_p0 = scmp.lt.s32.totalorder %s869_s19, %s1164_s0 }
  0x1d   : > { %p877_p2 = scmp.lt.s32.totalorder %s875_s24, %s870_s20 }
  0x1e   : > { %p873_p10 = pnand %p872_p9, %p871_p7 }
  0x1f   : > { %p878_p6 = por %p877_p2, %p876_p0 }
  0x20   : > { %p874_p11 = pneg %p873_p10 }
  0x22   : > { %p879_p5 = pnand %p878_p6, %p874_p11 }
  0x24   : > { %882 = shalt.err (!%p879_p5)
}
  0x25   : > { %769 = dma.hbm_to_vmem [thread:$0]  (!%p1067_p8), %s136_s8, 512, %s138_s14, %s125_s18  }
  0x26   : > { %146 = sbr.rel (%p1022_p3) target bundleno = 536 (0x218), region = 28  ;;  %s1084_s29 = sand.u32 (!%p1022_p3), 1, %s960_s10  }
  0x27   : > { %s720_s4 = sshll.u32 (!%p1022_p3), %s1084_s29, 5  ;;  %s149_s5 = scalar_lea.sflag (!%p1022_p3), [#allocation3], %s1084_s29 }
  0x28   : > { %s152_s6 = scalar_lea.vmem (!%p1022_p3), [#allocation2], %s720_s4 }
  0x2b   : > { %943 = dma.done.wait (%p1049_p12), %s149_s5, 512  }
  0x2c   : > { %945 = vsyncadd (%p1049_p12), %s149_s5, 4294966784 }
  0x2d   : > { %947 = dma.done.wait (%p40_p1), [#allocation6], 256  }
  0x2e   : > { %949 = vsyncadd (%p40_p1), [#allocation6], 4294967040  ;;  %v973_v0 = vmov 7   ;;  %vm203_vm0 = vcmask 1046528   ;;  %vm198_vm1 = vcmask 56320   ;;  %v185_v5 = vld [vmem:[#allocation5] sm:$0xff] }
  0x2f   : > { %818 = vset.pattern.permute.xlu0 %v973_v0  ;;  %v181_v1 = vld [vmem:[%s152_s6] sm:$0x7f]  ;;  %v182_v2 = vld [vmem:[%s152_s6 + $0x8] sm:$0x7f]  ;;  %v183_v3 = vld [vmem:[%s152_s6 + $0x10] sm:$0x7f] }
  0x30   : > { %723 = vmatpush.msk.msra.mxu0 %vm203_vm0, %v181_v1  ;;  %726 = vmatpush.msk.msra.mxu1 %vm203_vm0, %v182_v2  ;;  %v184_v4 = vld [vmem:[%s152_s6 + $0x18] sm:$0x7f]  ;;  %v186_v6 = vld [vmem:[#allocation5 + $0x8] sm:$0xff]  ;;  %s974_s17 = smov 120   ;;  %v187_v8 = vld [vmem:[#allocation5] sm:$0xf] }
  0x31   : > { %729 = vmatpush.msk.msra.mxu2 %vm203_vm0, %v183_v3  ;;  %732 = vmatpush.msk.msra.mxu3 %vm203_vm0, %v184_v4  ;;  %s975_s27 = smov 103   ;;  %v976_v11 = vmov 24   ;;  %vm328_vm2 = vcmask 130048   ;;  %v977_v37 = vmov 41   ;;  %vm522_vm3 = vcmask 1043456   ;;  %s722_s7 = sshll.u32 %s1084_s29, 4 }
  0x32   : > { %724 = vmatmul.msk.f32.vlgmr.msra.gmra.mxu0 %vm198_vm1, %v185_v5  ;;  %727 = vmatmul.msk.f32.vlgmr.msra.gmra.mxu1 %vm198_vm1, %v185_v5  ;;  %s178_s8 = scalar_lea.vmem [#allocation7], %s722_s7  ;;  %s753_s13 = sshll.u32 %s1017_s16, 4 }
  0x33   : > { %730 = vmatmul.msk.f32.vlgmr.msra.gmra.mxu2 %vm198_vm1, %v185_v5  ;;  %733 = vmatmul.msk.f32.vlgmr.msra.gmra.mxu3 %vm198_vm1, %v185_v5  ;;  %s627_s18 = scalar_lea.hbm %s1166_s2, %s753_s13  ;;  %s629_s19 = sshll.u32 %s178_s8, 4  ;;  %s630_s19 = int_to_ptr.vmem [resolvable:$true] %s629_s19 }
  0x34   : > { %195 = vperm.xlu0 %818, %v186_v6   ;;  %324 = vrot.lane.b32.xlu1 %v185_v5, %s974_s17  ;;  %s631_s20 = sshll.u32 %s627_s18, 4  ;;  %s616_s16 = scalar_lea.sflag [#allocation4], %s1084_s29  ;;  %s632_s20 = int_to_ptr.hbm [resolvable:$true] %s631_s20 }
  0x35   : > { %819 = vset.pattern.permute.xlu2 %v976_v11  ;;  %820 = vset.pattern.permute.xlu1 %v977_v37  ;;  %s912_s21 = sshra.s32 %s632_s20, 4  ;;  %s918_s3 = scalar_lea.hbm %s1166_s2, 32  ;;  %s913_s21 = int_to_ptr.hbm [resolvable:$true] %s912_s21 }
  0x36   : > { %321 = vperm.xlu2 %819, %v186_v6   ;;  %s914_s22 = scalar_lea.hbm %s913_s21, 16  ;;  %p919_p12 = scmp.lt.s32.totalorder %s913_s21, %s1166_s2 }
  0x37   : > { %p915_p1 = scmp.ne.s32.totalorder %s913_s21, %s914_s22  ;;  %p920_p8 = scmp.lt.s32.totalorder %s918_s3, %s914_s22 }
  0x39   : > { %p916_p3 = pnand %p915_p1, %p1053_p13  ;;  %p921_p7 = por %p920_p8, %p919_p12 }
  0x3a   : > { %725 = vmatmul.msk.f32.gmra.mxu0 %vm198_vm1, %v186_v6  ;;  %728 = vmatmul.msk.f32.gmra.mxu1 %vm198_vm1, %v186_v6 }
  0x3b   : > { %731 = vmatmul.msk.f32.gmra.mxu2 %vm198_vm1, %v186_v6  ;;  %734 = vmatmul.msk.f32.gmra.mxu3 %vm198_vm1, %v186_v6  ;;  %p917_p5 = pneg %p916_p3 }
  0x3c   : > { %190 = vperm.xlu0 %818, %v185_v5   ;;  %326 = vrot.lane.b32.xlu1 %v186_v6, %s974_s17 }
  0x3d   : > { %p922_p9 = pnand %p921_p7, %p917_p5 }
  0x3e   : > { %317 = vperm.xlu2 %819, %v185_v5  }
  0x44   : > { %438 = vrot.lane.b32.xlu0 %v187_v8, %s975_s27  ;;  %435 = vperm.xlu1 %820, %v187_v8  }
  0x45   : > { %821 = vset.pattern.permute.xlu0 %v977_v37 }
  0x90   : > { %v322_v38 = vpop.permute.xlu2 %321 }
  0x98   : > { %v318_v41 = vpop.permute.xlu2 %317 }
  0xa6   : > { %v196_v7 = vpop.permute.xlu0 %195  ;;  %v325_v23 = vpop.permute.xlu1 %324 }
  0xae   : > { %v191_v12 = vpop.permute.xlu0 %190  ;;  %v327_v36 = vpop.permute.xlu1 %326 }
  0xaf   : > { %v233_v9 = vpop.f32.mrf.mxu0  ;;  %v256_v10 = vpop.f32.mrf.mxu1 }
  0xb0   : > { %v234_v19 = vadd.f32 %v233_v9, %v191_v12  ;;  %v257_v20 = vadd.f32 %v256_v10, %v191_v12 }
  0xb2   : > { %v308_v24 = vmax.f32 %v234_v19, 0.0  ;;  %v309_v25 = vmax.f32 %v257_v20, 0.0 }
  0xb6   : > { %v279_v13 = vpop.f32.mrf.mxu2  ;;  %v302_v14 = vpop.f32.mrf.mxu3 }
  0xb7   : > { %v236_v15 = vpop.f32.mrf.mxu0  ;;  %v259_v16 = vpop.f32.mrf.mxu1  ;;  %v280_v26 = vadd.f32 %v279_v13, %v191_v12  ;;  %v303_v29 = vadd.f32 %v302_v14, %v191_v12 }
  0xb8   : > { %v237_v17 = vadd.f32 %v236_v15, %v196_v7  ;;  %v260_v18 = vadd.f32 %v259_v16, %v196_v7  ;;  %v439_v50 = vpop.permute.xlu0 %438  ;;  %v436_v1 = vpop.permute.xlu1 %435 }
  0xb9   : > { %v310_v34 = vmax.f32 %v280_v26, 0.0  ;;  %v311_v35 = vmax.f32 %v303_v29, 0.0 }
  0xba   : > { %v312_v21 = vmax.f32 %v237_v17, 0.0  ;;  %v313_v22 = vmax.f32 %v260_v18, 0.0 }
  0xbc   : > { %347 = vmatpush.msrb.mxu0 %v312_v21  ;;  %370 = vmatpush.msrb.mxu1 %v313_v22 }
  0xbe   : > { %v282_v27 = vpop.f32.mrf.mxu2  ;;  %v305_v28 = vpop.f32.mrf.mxu3  ;;  %348 = vmatpush.msrb.mxu0 %v308_v24  ;;  %371 = vmatpush.msrb.mxu1 %v309_v25 }
  0xbf   : > { %v283_v30 = vadd.f32 %v282_v27, %v196_v7  ;;  %v306_v31 = vadd.f32 %v305_v28, %v196_v7  ;;  %735 = vmatmul.msk.f32.vlgmr.msrb.gmra.mxu0 %vm328_vm2, %v325_v23  ;;  %737 = vmatmul.msk.f32.vlgmr.msrb.gmra.mxu1 %vm328_vm2, %v325_v23 }
  0xc1   : > { %v314_v32 = vmax.f32 %v283_v30, 0.0  ;;  %v315_v33 = vmax.f32 %v306_v31, 0.0 }
  0xc3   : > { %393 = vmatpush.msrb.mxu2 %v314_v32  ;;  %416 = vmatpush.msrb.mxu3 %v315_v33 }
  0xc5   : > { %394 = vmatpush.msrb.mxu2 %v310_v34  ;;  %417 = vmatpush.msrb.mxu3 %v311_v35 }
  0xc6   : > { %739 = vmatmul.msk.f32.vlgmr.msrb.gmra.mxu2 %vm328_vm2, %v325_v23  ;;  %741 = vmatmul.msk.f32.vlgmr.msrb.gmra.mxu3 %vm328_vm2, %v325_v23 }
  0xc7   : > { %736 = vmatmul.msk.f32.gmra.mxu0 %vm328_vm2, %v327_v36  ;;  %738 = vmatmul.msk.f32.gmra.mxu1 %vm328_vm2, %v327_v36 }
  0xce   : > { %740 = vmatmul.msk.f32.gmra.mxu2 %vm328_vm2, %v327_v36  ;;  %742 = vmatmul.msk.f32.gmra.mxu3 %vm328_vm2, %v327_v36 }
 0x13c   : > { %v350_v39 = vpop.f32.mrf.mxu0  ;;  %v373_v40 = vpop.f32.mrf.mxu1 }
 0x13d   : > { %v351_v44 = vadd.f32 %v350_v39, %v318_v41  ;;  %v374_v45 = vadd.f32 %v373_v40, %v318_v41 }
 0x13f   : > { %v425_v53 = vmax.f32 %v351_v44, 0.0  ;;  %v426_v54 = vmax.f32 %v374_v45, 0.0 }
 0x144   : > { %v353_v42 = vpop.f32.mrf.mxu0  ;;  %v376_v43 = vpop.f32.mrf.mxu1 }
 0x145   : > { %v354_v46 = vadd.f32 %v353_v42, %v322_v38  ;;  %v377_v47 = vadd.f32 %v376_v43, %v322_v38 }
 0x147   : > { %v429_v48 = vmax.f32 %v354_v46, 0.0  ;;  %v430_v49 = vmax.f32 %v377_v47, 0.0 }
 0x149   : > { %v396_v51 = vpop.f32.mrf.mxu2  ;;  %v419_v52 = vpop.f32.mrf.mxu3  ;;  %456 = vmatpush.msra.mxu0 %v429_v48  ;;  %476 = vmatpush.msra.mxu1 %v430_v49 }
 0x14a   : > { %v397_v57 = vadd.f32 %v396_v51, %v318_v41  ;;  %v420_v58 = vadd.f32 %v419_v52, %v318_v41 }
 0x14b   : > { %457 = vmatpush.msra.mxu0 %v425_v53  ;;  %477 = vmatpush.msra.mxu1 %v426_v54 }
 0x14c   : > { %743 = vmatmul.msk.f32.vlgmr.msra.gmra.mxu0 %vm328_vm2, %v439_v50  ;;  %744 = vmatmul.msk.f32.vlgmr.msra.gmra.mxu1 %vm328_vm2, %v439_v50  ;;  %v427_v63 = vmax.f32 %v397_v57, 0.0  ;;  %v428_v0 = vmax.f32 %v420_v58, 0.0 }
 0x151   : > { %v399_v55 = vpop.f32.mrf.mxu2  ;;  %v422_v56 = vpop.f32.mrf.mxu3 }
 0x152   : > { %v400_v59 = vadd.f32 %v399_v55, %v322_v38  ;;  %v423_v60 = vadd.f32 %v422_v56, %v322_v38 }
 0x154   : > { %v431_v61 = vmax.f32 %v400_v59, 0.0  ;;  %v432_v62 = vmax.f32 %v423_v60, 0.0 }
 0x156   : > { %496 = vmatpush.msra.mxu2 %v431_v61  ;;  %516 = vmatpush.msra.mxu3 %v432_v62 }
 0x158   : > { %497 = vmatpush.msra.mxu2 %v427_v63  ;;  %517 = vmatpush.msra.mxu3 %v428_v0 }
 0x159   : > { %745 = vmatmul.msk.f32.vlgmr.msra.gmra.mxu2 %vm328_vm2, %v439_v50  ;;  %746 = vmatmul.msk.f32.vlgmr.msra.gmra.mxu3 %vm328_vm2, %v439_v50 }
 0x1c9   : > { %v459_v2 = vpop.f32.mrf.mxu0  ;;  %v479_v3 = vpop.f32.mrf.mxu1 }
 0x1ca   : > { %v460_v4 = vadd.f32 %v459_v2, %v436_v1  ;;  %v480_v5 = vadd.f32 %v479_v3, %v436_v1 }
 0x1cc   : > { %v523_v6 = vsel %vm522_vm3, %v460_v4, -inf  ;;  %v530_v7 = vsel %vm522_vm3, %v480_v5, -inf }
 0x1cd   : > { %v524_v8 = vrot.slane %v523_v6, 4  ;;  %v531_v9 = vrot.slane %v530_v7, 4 }
 0x1cf   : > { %v525_v10 = vmax.f32 %v523_v6, %v524_v8  ;;  %v532_v11 = vmax.f32 %v530_v7, %v531_v9 }
 0x1d1   : > { %v526_v12 = vrot.slane %v525_v10, 2  ;;  %v533_v13 = vrot.slane %v532_v11, 2 }
 0x1d3   : > { %v527_v14 = vmax.f32 %v525_v10, %v526_v12  ;;  %v534_v15 = vmax.f32 %v532_v11, %v533_v13 }
 0x1d5   : > { %v528_v16 = vrot.slane %v527_v14, 1  ;;  %v535_v17 = vrot.slane %v534_v15, 1 }
 0x1d7   : > { %v529_v18 = vmax.f32 %v527_v14, %v528_v16  ;;  %v536_v19 = vmax.f32 %v534_v15, %v535_v17 }
 0x1d9   : > { %v1118_v20 = vsub.f32 %v460_v4, %v529_v18  ;;  %v552_v21 = vsub.f32 %v480_v5, %v536_v19 }
 0x1db   : > { %v555_v22 = vmul.f32 1.442695, %v1118_v20  ;;  %v557_v23 = vmul.f32 1.442695, %v552_v21 }
 0x1dc   : > { %v499_v24 = vpop.f32.mrf.mxu2  ;;  %v519_v25 = vpop.f32.mrf.mxu3 }
 0x1dd   : > { %822 = vpow2.f32 %v555_v22  ;;  %v500_v26 = vadd.f32 %v499_v24, %v436_v1  ;;  %v520_v27 = vadd.f32 %v519_v25, %v436_v1 }
 0x1de   : > { %824 = vpow2.f32 %v557_v23 }
 0x1df   : > { %v537_v28 = vsel %vm522_vm3, %v500_v26, -inf  ;;  %v544_v29 = vsel %vm522_vm3, %v520_v27, -inf }
 0x1e0   : > { %v538_v30 = vrot.slane %v537_v28, 4  ;;  %v545_v31 = vrot.slane %v544_v29, 4 }
 0x1e2   : > { %v539_v32 = vmax.f32 %v537_v28, %v538_v30  ;;  %v546_v33 = vmax.f32 %v544_v29, %v545_v31 }
 0x1e3   : > { %v823_v34 = vpop.eup %822 }
 0x1e4   : > { %v825_v35 = vpop.eup %824  ;;  %v563_v36 = vsel %vm522_vm3, %v823_v34, 0.0  ;;  %v540_v37 = vrot.slane %v539_v32, 2  ;;  %v547_v38 = vrot.slane %v546_v33, 2 }
 0x1e5   : > { %v564_v39 = vrot.slane %v563_v36, 4  ;;  %v570_v40 = vsel %vm522_vm3, %v825_v35, 0.0 }
 0x1e6   : > { %v571_v41 = vrot.slane %v570_v40, 4  ;;  %v541_v42 = vmax.f32 %v539_v32, %v540_v37  ;;  %v548_v43 = vmax.f32 %v546_v33, %v547_v38 }
 0x1e7   : > { %v565_v44 = vadd.f32 %v564_v39, %v563_v36 }
 0x1e8   : > { %v572_v45 = vadd.f32 %v571_v41, %v570_v40  ;;  %v542_v46 = vrot.slane %v541_v42, 1  ;;  %v549_v47 = vrot.slane %v548_v43, 1 }
 0x1e9   : > { %v566_v48 = vrot.slane %v565_v44, 2 }
 0x1ea   : > { %v573_v49 = vrot.slane %v572_v45, 2  ;;  %v543_v50 = vmax.f32 %v541_v42, %v542_v46  ;;  %v550_v51 = vmax.f32 %v548_v43, %v549_v47 }
 0x1eb   : > { %v567_v52 = vadd.f32 %v566_v48, %v565_v44 }
 0x1ec   : > { %v574_v53 = vadd.f32 %v573_v49, %v572_v45  ;;  %v553_v54 = vsub.f32 %v500_v26, %v543_v50  ;;  %v554_v55 = vsub.f32 %v520_v27, %v550_v51 }
 0x1ed   : > { %v568_v56 = vrot.slane %v567_v52, 1 }
 0x1ee   : > { %v575_v57 = vrot.slane %v574_v53, 1  ;;  %v559_v58 = vmul.f32 1.442695, %v553_v54  ;;  %v561_v60 = vmul.f32 1.442695, %v554_v55 }
 0x1ef   : > { %v569_v59 = vadd.f32 %v568_v56, %v567_v52 }
 0x1f0   : > { %v576_v61 = vadd.f32 %v575_v57, %v574_v53  ;;  %826 = vpow2.f32 %v559_v58 }
 0x1f1   : > { %828 = vlog2.f32 %v569_v59 }
 0x1f2   : > { %830 = vlog2.f32 %v576_v61 }
 0x1f3   : > { %832 = vpow2.f32 %v561_v60 }
 0x1f6   : > { %v827_v62 = vpop.eup %826 }
 0x1f7   : > { %v829_v63 = vpop.eup %828  ;;  %v577_v0 = vsel %vm522_vm3, %v827_v62, 0.0 }
 0x1f8   : > { %v831_v1 = vpop.eup %830  ;;  %v578_v2 = vrot.slane %v577_v0, 4  ;;  %v592_v4 = vmul.f32 0.6931472, %v829_v63 }
 0x1f9   : > { %v833_v3 = vpop.eup %832  ;;  %v594_v5 = vmul.f32 0.6931472, %v831_v1 }
 0x1fa   : > { %v579_v6 = vadd.f32 %v578_v2, %v577_v0  ;;  %v584_v7 = vsel %vm522_vm3, %v833_v3, 0.0  ;;  %v599_v11 = vsub.f32 %v1118_v20, %v592_v4 }
 0x1fb   : > { %v600_v8 = vsub.f32 %v552_v21, %v594_v5  ;;  %v585_v9 = vrot.slane %v584_v7, 4 }
 0x1fc   : > { %v580_v10 = vrot.slane %v579_v6, 2 }
 0x1fd   : > { %v607_v12 = vrot.slane %v600_v8, 4  ;;  %v586_v13 = vadd.f32 %v585_v9, %v584_v7 }
 0x1fe   : > { %v581_v14 = vadd.f32 %v580_v10, %v579_v6 }
 0x1ff   : > { %v609_v15 = vsel %vm522_vm3, %v599_v11, %v607_v12  ;;  %v587_v16 = vrot.slane %v586_v13, 2 }
 0x200   : > { %v582_v17 = vrot.slane %v581_v14, 1  ;;  %613 = vst [vmem:[%s178_s8] sm:$0xff] %v609_v15 }
 0x201   : > { %v588_v18 = vadd.f32 %v587_v16, %v586_v13 }
 0x202   : > { %v583_v19 = vadd.f32 %v582_v17, %v581_v14 }
 0x203   : > { %v589_v22 = vrot.slane %v588_v18, 1 }
 0x204   : > { %834 = vlog2.f32 %v583_v19 }
 0x205   : > { %v590_v23 = vadd.f32 %v589_v22, %v588_v18 }
 0x207   : > { %836 = vlog2.f32 %v590_v23 }
 0x20a   : > { %v835_v21 = vpop.eup %834 }
 0x20b   : > { %v596_v20 = vmul.f32 0.6931472, %v835_v21 }
 0x20d   : > { %v837_v24 = vpop.eup %836  ;;  %v601_v27 = vsub.f32 %v553_v54, %v596_v20 }
 0x20e   : > { %v598_v25 = vmul.f32 0.6931472, %v837_v24 }
 0x210   : > { %v602_v26 = vsub.f32 %v554_v55, %v598_v25 }
 0x212   : > { %v608_v28 = vrot.slane %v602_v26, 4 }
 0x214   : > { %v610_v29 = vsel %vm522_vm3, %v601_v27, %v608_v28 }
 0x215   : > { %614 = vst [vmem:[%s178_s8 + $0x8] sm:$0xff] %v610_v29 }
 0x216   : > { %925 = shalt.err (!%p922_p9)
}
 0x217   : > { %760 = dma.vmem_to_hbm [thread:$0]  (%p1053_p13), %s630_s19, 256, %s632_s20, %s616_s16  }
 0x218 PF: > { %s643_s29 = sand.u32 1, %s956_s9   ;;  %p1172_p10 = scmp.ge.s32.totalorder %s968_s12, 2 }
 0x219   : > { %s644_s6 = scalar_lea.sflag [#allocation4], %s643_s29 }
 0x21a   : > { %p771_p11 = pnand %p1172_p10, %p1058_p4 }
 0x21c   : > { %p772_p0 = pneg %p771_p11 }
 0x21e   : > { %951 = dma.done.wait (%p772_p0), %s644_s6, 256  }
 0x21f   : > { %953 = vsyncadd (%p772_p0), %s644_s6, 4294967040  ;;  %p16_p2 = scmp.ge.s32.totalorder %s1033_s23, 4   ;;  %s1173_s9 = smov %s960_s10 }
 0x220   : > { %s1174_s10 = smov %s964_s11  ;;  %s1175_s11 = smov %s1045_s26 }
 0x221   : > { %s1176_s12 = smov %s1033_s23  ;;  %18 = sbr.rel (!%p16_p2) target bundleno = 6 (0x6), region = 77 }
 0x226   :  { %650 = vsyncpa [#allocation3], 1 }
 0x227   :  { %652 = vsyncpa [#allocation3 + $0x1], 1 }
 0x228   :  { %653 = vsyncpa [#allocation6], 1 }
 0x229   :  { %654 = vsyncpa [#allocation4], 1 }
 0x22a   :  { %656 = vsyncpa [#allocation4 + $0x1], 1 }

</bundles_post_ra>
